<compile_context>
chip_gen: v7x
topology: tpu7x:2x2x1
jax: 0.10.0
libtpu: 0.0.40
codegen_flags: <defaults>
</compile_context>

<pallas_src>
import jax
import jax.numpy as jnp
from jax.experimental import pallas as pl
from jax.experimental.pallas import tpu as pltpu

HIDDEN = 256            # per-head hidden width
H2 = 2 * HIDDEN         # fused (both heads) hidden width = 512
OUT_LANES = 128         # lane-dense padded output width (col 0 = q1, col 1 = q2)
MAX_BATCH_BLOCK = 1024  # batch tile size for large batches


def _critic_kernel(s_ref, a_ref, w1s_ref, w1a_ref, w2_ref, w3_ref, b_ref,
                   out_ref):
    """Fused two-head critic forward for one batch tile.

    h1  = relu(state @ W1s + action @ W1a + b1)   -> (Bm, 512)
    h2  = relu(h1 @ W2_blockdiag + b2)            -> (Bm, 512)
    out = h2 @ W3_padded + b3                     -> (Bm, 128)
    """
    b = b_ref[...]                  # (3, 512) packed biases (row 2 padded)
    b1 = b[0:1, :]                  # (1, 512)
    b2 = b[1:2, :]                  # (1, 512)
    b3 = b[2:3, :OUT_LANES]         # (1, 128)

    s = s_ref[...]
    a = a_ref[...]

    h1 = jnp.dot(s, w1s_ref[...], preferred_element_type=jnp.float32)
    h1 = h1 + jnp.dot(a, w1a_ref[...], preferred_element_type=jnp.float32)
    h1 = jnp.maximum(h1 + b1, 0.0)

    h2 = jnp.dot(h1, w2_ref[...], preferred_element_type=jnp.float32)
    h2 = jnp.maximum(h2 + b2, 0.0)

    out_ref[...] = (
        jnp.dot(h2, w3_ref[...], preferred_element_type=jnp.float32) + b3)


def init_critic_params(key, state_dim, action_dim):
    """Per-head params mimicking nn.Linear's uniform(-1/sqrt(fan_in), ...) init.

    Weights are stored as (in_features, out_features) (transpose of PyTorch's
    Linear layout) so the math is x @ W + b. Biases are (1, out_features).
    """
    in_dim = state_dim + action_dim

    def linear(k, fan_in, fan_out):
        kw, kb = jax.random.split(k)
        bound = 1.0 / jnp.sqrt(jnp.float32(fan_in))
        w = jax.random.uniform(kw, (fan_in, fan_out), jnp.float32, -bound, bound)
        b = jax.random.uniform(kb, (1, fan_out), jnp.float32, -bound, bound)
        return w, b

    keys = jax.random.split(key, 6)
    params = {}
    for head_i, head_name in enumerate(("q1", "q2")):
        w1, b1 = linear(keys[head_i * 3 + 0], in_dim, HIDDEN)
        w2, b2 = linear(keys[head_i * 3 + 1], HIDDEN, HIDDEN)
        w3, b3 = linear(keys[head_i * 3 + 2], HIDDEN, 1)
        params[head_name] = {"w1": w1, "b1": b1, "w2": w2, "b2": b2,
                             "w3": w3, "b3": b3}
    return params


def pack_critic_params(params, state_dim):
    """One-time packing of both heads into the fused kernel layout."""
    p1, p2 = params["q1"], params["q2"]

    # Layer 1: heads side-by-side along output axis, then split by input rows
    # (state rows vs action rows) so no wrapper concat is needed.
    w1 = jnp.concatenate([p1["w1"], p2["w1"]], axis=1)           # (in_dim, 512)
    w1s = w1[:state_dim]                                          # (state_dim, 512)
    w1a = w1[state_dim:]                                          # (action_dim, 512)
    b1 = jnp.concatenate([p1["b1"], p2["b1"]], axis=1)            # (1, 512)

    # Layer 2: block-diagonal so one matmul serves both heads exactly.
    z = jnp.zeros((HIDDEN, HIDDEN), jnp.float32)
    w2 = jnp.block([[p1["w2"], z], [z, p2["w2"]]])                # (512, 512)
    b2 = jnp.concatenate([p1["b2"], p2["b2"]], axis=1)            # (1, 512)

    # Layer 3: lane-padded to 128 outputs; column 0 = q1 head, column 1 = q2.
    w3 = jnp.zeros((H2, OUT_LANES), jnp.float32)
    w3 = w3.at[:HIDDEN, 0].set(p1["w3"][:, 0])
    w3 = w3.at[HIDDEN:, 1].set(p2["w3"][:, 0])                    # (512, 128)

    # Packed biases: one (3, 512) buffer; row 2 holds b3 padded with zeros.
    b = jnp.zeros((3, H2), jnp.float32)
    b = b.at[0, :].set(b1[0])
    b = b.at[1, :].set(b2[0])
    b = b.at[2, 0].set(p1["b3"][0, 0])
    b = b.at[2, 1].set(p2["b3"][0, 0])

    return {"w1s": w1s, "w1a": w1a, "w2": w2, "w3": w3, "b": b}


def critic_forward(state, action, packed):
    """Pallas implementation of Critic.forward(state, action) -> (q1, q2)."""
    B, state_dim = state.shape
    action_dim = action.shape[1]

    block_b = B if B <= MAX_BATCH_BLOCK else MAX_BATCH_BLOCK
    grid = (pl.cdiv(B, block_b),)

    out = pl.pallas_call(
        _critic_kernel,
        out_shape=jax.ShapeDtypeStruct((B, OUT_LANES), jnp.float32),
        grid=grid,
        in_specs=[
            pl.BlockSpec((block_b, state_dim), lambda i: (i, 0)),   # state tile
            pl.BlockSpec((block_b, action_dim), lambda i: (i, 0)),  # action tile
            pl.BlockSpec((state_dim, H2), lambda i: (0, 0)),        # W1 (state rows)
            pl.BlockSpec((action_dim, H2), lambda i: (0, 0)),       # W1 (action rows)
            pl.BlockSpec((H2, H2), lambda i: (0, 0)),               # W2 block-diag
            pl.BlockSpec((H2, OUT_LANES), lambda i: (0, 0)),        # W3 padded
            pl.BlockSpec((3, H2), lambda i: (0, 0)),                # packed biases
        ],
        out_specs=pl.BlockSpec((block_b, OUT_LANES), lambda i: (i, 0)),
        compiler_params=pltpu.CompilerParams(
            dimension_semantics=("parallel",)),
    )(state, action, packed["w1s"], packed["w1a"], packed["w2"],
      packed["w3"], packed["b"])

    q1 = out[:, 0:1]
    q2 = out[:, 1:2]
    return q1, q2


def critic_forward_ref(state, action, params):
    """Plain-JAX reference matching the PyTorch module."""
    sa = jnp.concatenate([state, action], axis=1)

    def head(p):
        h1 = jnp.maximum(sa @ p["w1"] + p["b1"], 0.0)
        h2 = jnp.maximum(h1 @ p["w2"] + p["b2"], 0.0)
        return h2 @ p["w3"] + p["b3"]

    return head(params["q1"]), head(params["q2"])


if __name__ == "__main__":
    key = jax.random.PRNGKey(0)
    k_params, k_state, k_action = jax.random.split(key, 3)

    batch = 2
    state_dim = 8
    action_dim = 4

    params = init_critic_params(k_params, state_dim, action_dim)
    packed = pack_critic_params(params, state_dim)   # packed once, reused per step

    state = jax.random.normal(k_state, (batch, state_dim), jnp.float32)
    action = jax.random.normal(k_action, (batch, action_dim), jnp.float32)

    q1, q2 = critic_forward(state, action, packed)
    jax.block_until_ready((q1, q2))

    q1_ref, q2_ref = critic_forward_ref(state, action, params)
    assert q1.shape == (batch, 1) and q2.shape == (batch, 1)
    assert jnp.allclose(q1, q1_ref, atol=1e-4, rtol=1e-4)
    assert jnp.allclose(q2, q2_ref, atol=1e-4, rtol=1e-4)

    print("KERNEL_OK")
</pallas_src>

<mosaic_0001>
module attributes {stable_mosaic.version = 11 : i64} {
  func.func @_critic_kernel(%arg0: i32, %arg1: memref<2x8xf32, #tpu.memory_space<vmem>>, %arg2: memref<2x4xf32, #tpu.memory_space<vmem>>, %arg3: memref<8x512xf32, #tpu.memory_space<vmem>>, %arg4: memref<4x512xf32, #tpu.memory_space<vmem>>, %arg5: memref<512x512xf32, #tpu.memory_space<vmem>>, %arg6: memref<512x128xf32, #tpu.memory_space<vmem>>, %arg7: memref<3x512xf32, #tpu.memory_space<vmem>>, %arg8: memref<2x128xf32, #tpu.memory_space<vmem>>) attributes {dimension_semantics = [#tpu.dimension_semantics<parallel>], iteration_bounds = array<i64: 1>, scalar_prefetch = 0 : i64, scratch_operands = 0 : i64, tpu.core_type = #tpu.core_type<tc>, window_params = [{transform_indices = @transform_0, window_bounds = array<i64: 2, 8>}, {transform_indices = @transform_1, window_bounds = array<i64: 2, 4>}, {pipeline_mode = #tpu.pipeline_mode<synchronous>, transform_indices = @transform_2, window_bounds = array<i64: 8, 512>}, {pipeline_mode = #tpu.pipeline_mode<synchronous>, transform_indices = @transform_3, window_bounds = array<i64: 4, 512>}, {pipeline_mode = #tpu.pipeline_mode<synchronous>, transform_indices = @transform_4, window_bounds = array<i64: 512, 512>}, {pipeline_mode = #tpu.pipeline_mode<synchronous>, transform_indices = @transform_5, window_bounds = array<i64: 512, 128>}, {pipeline_mode = #tpu.pipeline_mode<synchronous>, transform_indices = @transform_6, window_bounds = array<i64: 3, 512>}, {transform_indices = @transform_7, window_bounds = array<i64: 2, 128>}]} {
    %c0 = arith.constant 0 : index
    %c0_0 = arith.constant 0 : index
    %0 = vector.load %arg7[%c0, %c0_0] : memref<3x512xf32, #tpu.memory_space<vmem>>, vector<3x512xf32>
    %1 = vector.extract_strided_slice %0 {offsets = [0, 0], sizes = [1, 512], strides = [1, 1]} : vector<3x512xf32> to vector<1x512xf32>
    %2 = vector.extract_strided_slice %0 {offsets = [1, 0], sizes = [1, 512], strides = [1, 1]} : vector<3x512xf32> to vector<1x512xf32>
    %3 = vector.extract_strided_slice %0 {offsets = [2, 0], sizes = [1, 128], strides = [1, 1]} : vector<3x512xf32> to vector<1x128xf32>
    %c0_1 = arith.constant 0 : index
    %c0_2 = arith.constant 0 : index
    %4 = vector.load %arg1[%c0_1, %c0_2] : memref<2x8xf32, #tpu.memory_space<vmem>>, vector<2x8xf32>
    %c0_3 = arith.constant 0 : index
    %c0_4 = arith.constant 0 : index
    %5 = vector.load %arg2[%c0_3, %c0_4] : memref<2x4xf32, #tpu.memory_space<vmem>>, vector<2x4xf32>
    %c0_5 = arith.constant 0 : index
    %c0_6 = arith.constant 0 : index
    %6 = vector.load %arg3[%c0_5, %c0_6] : memref<8x512xf32, #tpu.memory_space<vmem>>, vector<8x512xf32>
    %cst = arith.constant dense<0.000000e+00> : vector<2x512xf32>
    %7 = tpu.matmul %4, %6, %cst {dimension_numbers = #tpu.dot_dimension_numbers<[1], [0], [0], [1], [0, 0, 1, 1], [], []>} : vector<2x8xf32>, vector<8x512xf32>, vector<2x512xf32> -> vector<2x512xf32>
    %c0_7 = arith.constant 0 : index
    %c0_8 = arith.constant 0 : index
    %8 = vector.load %arg4[%c0_7, %c0_8] : memref<4x512xf32, #tpu.memory_space<vmem>>, vector<4x512xf32>
    %cst_9 = arith.constant dense<0.000000e+00> : vector<2x512xf32>
    %9 = tpu.matmul %5, %8, %cst_9 {dimension_numbers = #tpu.dot_dimension_numbers<[1], [0], [0], [1], [0, 0, 1, 1], [], []>} : vector<2x4xf32>, vector<4x512xf32>, vector<2x512xf32> -> vector<2x512xf32>
    %10 = arith.addf %7, %9 : vector<2x512xf32>
    %11 = vector.broadcast %1 : vector<1x512xf32> to vector<2x512xf32>
    %12 = arith.addf %10, %11 : vector<2x512xf32>
    %cst_10 = arith.constant 0.000000e+00 : f32
    %13 = vector.broadcast %cst_10 : f32 to vector<2x512xf32>
    %14 = arith.maximumf %12, %13 : vector<2x512xf32>
    %c0_11 = arith.constant 0 : index
    %c0_12 = arith.constant 0 : index
    %15 = vector.load %arg5[%c0_11, %c0_12] : memref<512x512xf32, #tpu.memory_space<vmem>>, vector<512x512xf32>
    %cst_13 = arith.constant dense<0.000000e+00> : vector<2x512xf32>
    %16 = tpu.matmul %14, %15, %cst_13 {dimension_numbers = #tpu.dot_dimension_numbers<[1], [0], [0], [1], [0, 0, 1, 1], [], []>} : vector<2x512xf32>, vector<512x512xf32>, vector<2x512xf32> -> vector<2x512xf32>
    %17 = vector.broadcast %2 : vector<1x512xf32> to vector<2x512xf32>
    %18 = arith.addf %16, %17 : vector<2x512xf32>
    %cst_14 = arith.constant 0.000000e+00 : f32
    %19 = vector.broadcast %cst_14 : f32 to vector<2x512xf32>
    %20 = arith.maximumf %18, %19 : vector<2x512xf32>
    %c0_15 = arith.constant 0 : index
    %c0_16 = arith.constant 0 : index
    %21 = vector.load %arg6[%c0_15, %c0_16] : memref<512x128xf32, #tpu.memory_space<vmem>>, vector<512x128xf32>
    %cst_17 = arith.constant dense<0.000000e+00> : vector<2x128xf32>
    %22 = tpu.matmul %20, %21, %cst_17 {dimension_numbers = #tpu.dot_dimension_numbers<[1], [0], [0], [1], [0, 0, 1, 1], [], []>} : vector<2x512xf32>, vector<512x128xf32>, vector<2x128xf32> -> vector<2x128xf32>
    %23 = vector.broadcast %3 : vector<1x128xf32> to vector<2x128xf32>
    %24 = arith.addf %22, %23 : vector<2x128xf32>
    %c0_18 = arith.constant 0 : index
    %c0_19 = arith.constant 0 : index
    %25 = vector.load %arg8[%c0_18, %c0_19] : memref<2x128xf32, #tpu.memory_space<vmem>>, vector<2x128xf32>
    tpu.vector_store %arg8[%c0_18, %c0_19], %24 {strides = array<i32>} : memref<2x128xf32, #tpu.memory_space<vmem>>, vector<2x128xf32>,
    return
  }
  func.func @transform_0(%arg0: i32) -> (i32, i32) {
    %c0_i32 = arith.constant 0 : i32
    %c0_i32_0 = arith.constant 0 : i32
    return %arg0, %c0_i32 : i32, i32
  }
  func.func @transform_1(%arg0: i32) -> (i32, i32) {
    %c0_i32 = arith.constant 0 : i32
    %c0_i32_0 = arith.constant 0 : i32
    return %arg0, %c0_i32 : i32, i32
  }
  func.func @transform_2(%arg0: i32) -> (i32, i32) {
    %c0_i32 = arith.constant 0 : i32
    %c0_i32_0 = arith.constant 0 : i32
    %c0_i32_1 = arith.constant 0 : i32
    return %c0_i32, %c0_i32_0 : i32, i32
  }
  func.func @transform_3(%arg0: i32) -> (i32, i32) {
    %c0_i32 = arith.constant 0 : i32
    %c0_i32_0 = arith.constant 0 : i32
    %c0_i32_1 = arith.constant 0 : i32
    return %c0_i32, %c0_i32_0 : i32, i32
  }
  func.func @transform_4(%arg0: i32) -> (i32, i32) {
    %c0_i32 = arith.constant 0 : i32
    %c0_i32_0 = arith.constant 0 : i32
    %c0_i32_1 = arith.constant 0 : i32
    return %c0_i32, %c0_i32_0 : i32, i32
  }
  func.func @transform_5(%arg0: i32) -> (i32, i32) {
    %c0_i32 = arith.constant 0 : i32
    %c0_i32_0 = arith.constant 0 : i32
    %c0_i32_1 = arith.constant 0 : i32
    return %c0_i32, %c0_i32_0 : i32, i32
  }
  func.func @transform_6(%arg0: i32) -> (i32, i32) {
    %c0_i32 = arith.constant 0 : i32
    %c0_i32_0 = arith.constant 0 : i32
    %c0_i32_1 = arith.constant 0 : i32
    return %c0_i32, %c0_i32_0 : i32, i32
  }
  func.func @transform_7(%arg0: i32) -> (i32, i32) {
    %c0_i32 = arith.constant 0 : i32
    %c0_i32_0 = arith.constant 0 : i32
    return %arg0, %c0_i32 : i32, i32
  }
}

</mosaic_0001>

<bundles_post_ra>
// kernel: tpu_custom_call.1
= control target key start
LH: loop header
LB: loop body
LE: loop exit
PB: predicated region body
PF: predicated region fallthrough
CT: control target
= control target key end

     0   :  { %12 = vsyncpa [#allocation3], 0  ;;  %s1989_s0 = inlined_call_operand.hbm [shape: f32[2,8], index: 0, kind: input, shape index: {}]   ;;  %s1990_s1 = inlined_call_operand.vmem [shape: f32[2,4], index: 1, kind: input, shape index: {}]   ;;  %s1991_s2 = inlined_call_operand.hbm [shape: f32[8,512], index: 2, kind: input, shape index: {}]   ;;  %s1992_s3 = inlined_call_operand.hbm [shape: f32[4,512], index: 3, kind: input, shape index: {}]   ;;  %s1993_s4 = inlined_call_operand.hbm [shape: f32[512,512], index: 4, kind: input, shape index: {}]   ;;  %s1994_s5 = inlined_call_operand.hbm [shape: f32[512,128], index: 5, kind: input, shape index: {}]   ;;  %s1995_s6 = inlined_call_operand.vmem [shape: f32[3,512], index: 6, kind: input, shape index: {}]   ;;  %s1996_s7 = inlined_call_operand.hbm [shape: f32[2,128], index: 7, kind: output, shape index: {}]  }
   0x1   :  { %13 = vsyncpa [#allocation6], 0 }
   0x2   :  { %14 = vsyncpa [#allocation9], 0 }
   0x3   :  { %15 = vsyncpa [#allocation4], 0  ;;  %s1819_s24 = smov [#allocation5]   ;;  %s1820_s26 = smov [#allocation8]  }
   0x4   :  { %s34_s25 = sshll.u32 %s1819_s24, 4  ;;  %s53_s27 = sshll.u32 %s1820_s26, 4  ;;  %s35_s25 = int_to_ptr.vmem [resolvable:$true] %s34_s25  ;;  %s1870_s27 = int_to_ptr.vmem [resolvable:$true] %s53_s27 }
   0x5   :  { %s1679_s30 = scalar_lea.hbm %s1991_s2, 512 }
   0x6   :  { %p1680_p0 = scmp.ne.s32.totalorder %s1991_s2, %s1679_s30  ;;  %p1683_p1 = scmp.lt.u32.totalorder %s1679_s30, %s1991_s2 }
   0x8   :  { %p1685_p2 = pnand %p1683_p1, %p1680_p0 }
   0xa   :  { %1688 = shalt.err (!%p1685_p2)
}
   0xb   :  { %s1689_s12 = scalar_lea.vmem %s35_s25, 512  ;;  %p1694_p4 = scmp.lt.s32.totalorder %s35_s25, %s35_s25 }
   0xc   :  { %p1690_p3 = scmp.ne.s32.totalorder %s35_s25, %s1689_s12  ;;  %p1695_p5 = scmp.lt.s32.totalorder %s1689_s12, %s1689_s12 }
   0xe   :  { %p1696_p6 = por %p1695_p5, %p1694_p4 }
  0x10   :  { %p1697_p7 = pnand %p1696_p6, %p1690_p3 }
  0x12   :  { %1700 = shalt.err (!%p1697_p7)
}
  0x13   :  { %37 = dma.hbm_to_vmem [thread:$0]  %s1991_s2, 512, %s35_s25, [#allocation6]  }
  0x14   :  { %s1701_s17 = scalar_lea.hbm %s1993_s4, 32768 }
  0x15   :  { %p1702_p8 = scmp.ne.s32.totalorder %s1993_s4, %s1701_s17  ;;  %p1705_p9 = scmp.lt.u32.totalorder %s1701_s17, %s1993_s4 }
  0x17   :  { %p1707_p10 = pnand %p1705_p9, %p1702_p8 }
  0x19   :  { %1710 = shalt.err (!%p1707_p10)
}
  0x1a   :  { %s1711_s22 = scalar_lea.vmem %s1870_s27, 32768  ;;  %p1716_p12 = scmp.lt.s32.totalorder %s1870_s27, %s1870_s27 }
  0x1b   :  { %p1712_p11 = scmp.ne.s32.totalorder %s1870_s27, %s1711_s22  ;;  %p1717_p13 = scmp.lt.s32.totalorder %s1711_s22, %s1711_s22 }
  0x1d   :  { %p1718_p0 = por %p1717_p13, %p1716_p12 }
  0x1f   :  { %p1719_p1 = pnand %p1718_p0, %p1712_p11 }
  0x21   :  { %1722 = shalt.err (!%p1719_p1)
}
  0x22   :  { %s1821_s2 = smov 512   ;;  %s1822_s23 = smov 32  }
  0x23   :  { %59 = dma.hbm_to_vmem [thread:$0]  %s1993_s4, 32768, %s1870_s27, [#allocation9], %s1821_s2, %s1821_s2, %s1822_s23  }
  0x24   :  { %s1823_s26 = smov [#allocation2]   ;;  %s1824_s29 = smov [#allocation7]  }
  0x25   :  { %s22_s28 = sshll.u32 %s1823_s26, 4  ;;  %s44_s30 = sshll.u32 %s1824_s29, 4  ;;  %s23_s28 = int_to_ptr.vmem [resolvable:$true] %s22_s28  ;;  %s45_s30 = int_to_ptr.vmem [resolvable:$true] %s44_s30 }
  0x26   :  { %s1723_s10 = scalar_lea.hbm %s1989_s0, 32 }
  0x27   :  { %p1724_p2 = scmp.ne.s32.totalorder %s1989_s0, %s1723_s10  ;;  %p1727_p3 = scmp.lt.u32.totalorder %s1723_s10, %s1989_s0 }
  0x29   :  { %p1729_p4 = pnand %p1727_p3, %p1724_p2 }
  0x2b   :  { %1732 = shalt.err (!%p1729_p4)
}
  0x2c   :  { %s1733_s4 = scalar_lea.vmem %s23_s28, 32  ;;  %p1738_p6 = scmp.lt.s32.totalorder %s23_s28, %s23_s28 }
  0x2d   :  { %p1734_p5 = scmp.ne.s32.totalorder %s23_s28, %s1733_s4  ;;  %p1739_p7 = scmp.lt.s32.totalorder %s1733_s4, %s1733_s4 }
  0x2f   :  { %p1740_p8 = por %p1739_p7, %p1738_p6 }
  0x31   :  { %p1741_p9 = pnand %p1740_p8, %p1734_p5 }
  0x33   :  { %1744 = shalt.err (!%p1741_p9)
}
  0x34   :  { %25 = dma.hbm_to_vmem [thread:$0]  %s1989_s0, 32, %s23_s28, [#allocation3]  }
  0x35   :  { %s1745_s18 = scalar_lea.hbm %s1992_s3, 256 }
  0x36   :  { %p1746_p10 = scmp.ne.s32.totalorder %s1992_s3, %s1745_s18  ;;  %p1749_p11 = scmp.lt.u32.totalorder %s1745_s18, %s1992_s3 }
  0x38   :  { %p1751_p12 = pnand %p1749_p11, %p1746_p10 }
  0x3a   :  { %1754 = shalt.err (!%p1751_p12)
}
  0x3b   :  { %s1755_s2 = scalar_lea.vmem %s45_s30, 256  ;;  %p1760_p0 = scmp.lt.s32.totalorder %s45_s30, %s45_s30 }
  0x3c   :  { %p1756_p13 = scmp.ne.s32.totalorder %s45_s30, %s1755_s2  ;;  %p1761_p1 = scmp.lt.s32.totalorder %s1755_s2, %s1755_s2 }
  0x3e   :  { %p1762_p2 = por %p1761_p1, %p1760_p0 }
  0x40   :  { %p1763_p3 = pnand %p1762_p2, %p1756_p13 }
  0x42   :  { %1766 = shalt.err (!%p1763_p3)
}
  0x43   :  { %47 = dma.hbm_to_vmem [thread:$0]  %s1992_s3, 256, %s45_s30, [#allocation6]  }
  0x44   :  { %s1825_s24 = smov [#allocation10]   ;;  %s1767_s29 = scalar_lea.hbm %s1994_s5, 8192 }
  0x45   :  { %s65_s25 = sshll.u32 %s1825_s24, 4  ;;  %p1768_p4 = scmp.ne.s32.totalorder %s1994_s5, %s1767_s29  ;;  %s66_s25 = int_to_ptr.vmem [resolvable:$true] %s65_s25 }
  0x46   :  { %p1771_p5 = scmp.lt.u32.totalorder %s1767_s29, %s1994_s5 }
  0x48   :  { %p1773_p6 = pnand %p1771_p5, %p1768_p4 }
  0x4a   :  { %1776 = shalt.err (!%p1773_p6)
}
  0x4b   :  { %s1777_s12 = scalar_lea.vmem %s66_s25, 8192  ;;  %p1782_p8 = scmp.lt.s32.totalorder %s66_s25, %s66_s25 }
  0x4c   :  { %p1778_p7 = scmp.ne.s32.totalorder %s66_s25, %s1777_s12  ;;  %p1783_p9 = scmp.lt.s32.totalorder %s1777_s12, %s1777_s12 }
  0x4e   :  { %p1784_p10 = por %p1783_p9, %p1782_p8 }
  0x50   :  { %p1785_p11 = pnand %p1784_p10, %p1778_p7 }
  0x52   :  { %1788 = shalt.err (!%p1785_p11)
}
  0x53   :  { %s1826_s3 = smov 128   ;;  %s1827_s30 = smov 8  }
  0x54   :  { %71 = dma.hbm_to_vmem [thread:$0]  %s1994_s5, 8192, %s66_s25, [#allocation9], %s1826_s3, %s1826_s3, %s1827_s30  }
  0x55   :  { %1811 = dma.done.wait [#allocation3], 32  }
  0x56   :  { %1812 = vsyncadd [#allocation3], 4294967264 }
  0x57   :  { %1813 = dma.done.wait [#allocation6], 768  }
  0x58   :  { %1814 = vsyncadd [#allocation6], 4294966528 }
  0x59   :  { %1815 = dma.done.wait [#allocation9], 40960  }
  0x5a   :  { %1816 = vsyncadd [#allocation9], 4294926336  ;;  %v1828_v0 = vmov 0.0   ;;  %v97_v1 = vld [vmem:[#allocation7] sm:$0xff]  ;;  %vm107_vm0 = vcmask 1043456   ;;  %v98_v4 = vld [vmem:[#allocation7 + $0x8] sm:$0xff] }
  0x5b   :  { %180 = vmatprep.mubr.f32.mxu0 %v1828_v0  ;;  %251 = vmatprep.mubr.f32.mxu1 %v1828_v0  ;;  %v101_v2 = vcombine.high %v97_v1, %v97_v1  ;;  %v92_v3 = vld [vmem:[%s1990_s1] sm:$0x3]  ;;  %vm103_vm1 = vcmask 31744   ;;  %v93_v6 = vld [vmem:[#allocation5] sm:$0xff]  ;;  %v102_v7 = vcombine.high %v98_v4, %v98_v4  ;;  %v451_v8 = vld [vmem:[#allocation8 + $0x8] sm:$0xff]  ;;  %vm258_vm2 = vcmask 64512  }
  0x5c   :  { %v94_v5 = vld [vmem:[#allocation5 + $0x8] sm:$0xff]  ;;  %v455_v9 = vld [vmem:[#allocation8 + $0x28] sm:$0xff]  ;;  %v95_v14 = vld [vmem:[#allocation5 + $0x10] sm:$0xff] }
  0x5d   :  { %1256 = vmatprep.subr.msk.mxu0 %vm107_vm0, %v101_v2  ;;  %v453_v10 = vld [vmem:[#allocation8 + $0x18] sm:$0xff]  ;;  %1259 = vmatprep.subr.msk.mxu1 %vm107_vm0, %v102_v7  ;;  %v1334_v12 = vpack.c.bf16 %v455_v9, %v451_v8  ;;  %v96_v13 = vld [vmem:[#allocation5 + $0x18] sm:$0xff]  ;;  %v450_v16 = vld [vmem:[#allocation8] sm:$0xff] }
  0x5e   :  { %v457_v11 = vld [vmem:[#allocation8 + $0x38] sm:$0xff]  ;;  %1257 = vmatpush1.msk.msra.mxu0 %vm107_vm0, %v97_v1  ;;  %1260 = vmatpush1.msk.msra.mxu1 %vm107_vm0, %v98_v4  ;;  %v454_v17 = vld [vmem:[#allocation8 + $0x20] sm:$0xff]  ;;  %v459_v18 = vld [vmem:[#allocation8 + $0x48] sm:$0xff] }
  0x5f   :  { %1258 = vmatmul.mubr.msk.f32.vlgmr.msra.gmra.mrb[0].mxu0 %vm103_vm1, %v92_v3  ;;  %262 = vmatprep.subr.mxu0 %v94_v5  ;;  %v1462_v15 = vpack.c.bf16 %v457_v11, %v453_v10  ;;  %v463_v19 = vld [vmem:[#allocation8 + $0x68] sm:$0xff]  ;;  %v1336_v21 = vpack.c.bf16 %v454_v17, %v450_v16  ;;  %v452_v22 = vld [vmem:[#allocation8 + $0x10] sm:$0xff]  ;;  %v461_v24 = vld [vmem:[#allocation8 + $0x58] sm:$0xff] }
  0x60   :  { %263 = vmatpush1.msra.mxu0 %v93_v6  ;;  %326 = vmatprep.mubr.f32.mxu0 %v1828_v0  ;;  %v91_v20 = vld [vmem:[#allocation2] sm:$0x3]  ;;  %v456_v23 = vld [vmem:[#allocation8 + $0x30] sm:$0xff]  ;;  %v1338_v25 = vpack.c.bf16 %v463_v19, %v459_v18  ;;  %v465_v26 = vld [vmem:[#allocation8 + $0x78] sm:$0xff] }
  0x61   :  { %1335 = vmatprep.subr.bf16.mxu0 %v1334_v12  ;;  %1261 = vmatmul.mubr.msk.f32.vlgmr.msra.gmra.mrb[0].mxu1 %vm103_vm1, %v92_v3  ;;  %v458_v27 = vld [vmem:[#allocation8 + $0x40] sm:$0xff]  ;;  %v467_v29 = vld [vmem:[#allocation8 + $0x88] sm:$0xff]  ;;  %v1464_v31 = vpack.c.bf16 %v456_v23, %v452_v22  ;;  %v1466_v32 = vpack.c.bf16 %v465_v26, %v461_v24  ;;  %v460_v34 = vld [vmem:[#allocation8 + $0x50] sm:$0xff] }
  0x62   :  { %333 = vmatprep.subr.mxu1 %v96_v13  ;;  %397 = vmatprep.mubr.f32.mxu1 %v1828_v0  ;;  %v462_v28 = vld [vmem:[#allocation8 + $0x60] sm:$0xff]  ;;  %v471_v30 = vld [vmem:[#allocation8 + $0xa8] sm:$0xff]  ;;  %v464_v35 = vld [vmem:[#allocation8 + $0x70] sm:$0xff] }
  0x63   :  { %334 = vmatpush1.msra.mxu1 %v95_v14  ;;  %v1340_v33 = vpack.c.bf16 %v462_v28, %v458_v27  ;;  %v469_v36 = vld [vmem:[#allocation8 + $0x98] sm:$0xff]  ;;  %v1342_v37 = vpack.c.bf16 %v471_v30, %v467_v29  ;;  %v466_v39 = vld [vmem:[#allocation8 + $0x80] sm:$0xff]  ;;  %v475_v41 = vld [vmem:[#allocation8 + $0xc8] sm:$0xff]  ;;  %v1468_v43 = vpack.c.bf16 %v464_v35, %v460_v34 }
  0x64   :  { %1463 = vmatprep.subr.bf16.mxu1 %v1462_v15  ;;  %v473_v38 = vld [vmem:[#allocation8 + $0xb8] sm:$0xff]  ;;  %v470_v40 = vld [vmem:[#allocation8 + $0xa0] sm:$0xff]  ;;  %v479_v42 = vld [vmem:[#allocation8 + $0xe8] sm:$0xff] }
  0x65   :  { %v1470_v44 = vpack.c.bf16 %v473_v38, %v469_v36  ;;  %v1344_v45 = vpack.c.bf16 %v470_v40, %v466_v39  ;;  %v468_v46 = vld [vmem:[#allocation8 + $0x90] sm:$0xff]  ;;  %v477_v48 = vld [vmem:[#allocation8 + $0xd8] sm:$0xff]  ;;  %v1346_v49 = vpack.c.bf16 %v479_v42, %v475_v41  ;;  %v474_v51 = vld [vmem:[#allocation8 + $0xc0] sm:$0xff] }
  0x66   :  { %v472_v47 = vld [vmem:[#allocation8 + $0xb0] sm:$0xff]  ;;  %v481_v50 = vld [vmem:[#allocation8 + $0xf8] sm:$0xff]  ;;  %v478_v52 = vld [vmem:[#allocation8 + $0xe0] sm:$0xff] }
  0x67   :  { %1262 = vmatmul.mubr.msk.f32.vlgmr.msra.gmra.mrb[0].mxu0 %vm258_vm2, %v91_v20  ;;  %v483_v53 = vld [vmem:[#allocation8 + $0x108] sm:$0xff]  ;;  %v1472_v55 = vpack.c.bf16 %v472_v47, %v468_v46  ;;  %v1474_v56 = vpack.c.bf16 %v481_v50, %v477_v48  ;;  %v1348_v57 = vpack.c.bf16 %v478_v52, %v474_v51  ;;  %v476_v58 = vld [vmem:[#allocation8 + $0xd0] sm:$0xff]  ;;  %v485_v60 = vld [vmem:[#allocation8 + $0x118] sm:$0xff] }
  0x68   :  { %1337 = vmatpush1.bf16.msra.mxu0 %v1336_v21  ;;  %v487_v54 = vld [vmem:[#allocation8 + $0x128] sm:$0xff]  ;;  %v480_v59 = vld [vmem:[#allocation8 + $0xf0] sm:$0xff]  ;;  %v489_v62 = vld [vmem:[#allocation8 + $0x138] sm:$0xff] }
  0x69   :  { %1339 = vmatprep.subr.bf16.mxu0 %v1338_v25  ;;  %1263 = vmatmul.mubr.msk.f32.vlgmr.msra.gmra.mrb[0].mxu1 %vm258_vm2, %v91_v20  ;;  %v1350_v61 = vpack.c.bf16 %v487_v54, %v483_v53  ;;  %v482_v63 = vld [vmem:[#allocation8 + $0x100] sm:$0xff]  ;;  %v491_v1 = vld [vmem:[#allocation8 + $0x148] sm:$0xff]  ;;  %v1476_v3 = vpack.c.bf16 %v480_v59, %v476_v58  ;;  %v1478_v4 = vpack.c.bf16 %v489_v62, %v485_v60  ;;  %v484_v6 = vld [vmem:[#allocation8 + $0x110] sm:$0xff] }
  0x6a   :  { %1465 = vmatpush1.bf16.msra.mxu1 %v1464_v31  ;;  %v486_v0 = vld [vmem:[#allocation8 + $0x120] sm:$0xff]  ;;  %v495_v2 = vld [vmem:[#allocation8 + $0x168] sm:$0xff]  ;;  %v488_v7 = vld [vmem:[#allocation8 + $0x130] sm:$0xff] }
  0x6b   :  { %1467 = vmatprep.subr.bf16.mxu1 %v1466_v32  ;;  %v1352_v5 = vpack.c.bf16 %v486_v0, %v482_v63  ;;  %v493_v8 = vld [vmem:[#allocation8 + $0x158] sm:$0xff]  ;;  %v1354_v9 = vpack.c.bf16 %v495_v2, %v491_v1  ;;  %v490_v11 = vld [vmem:[#allocation8 + $0x140] sm:$0xff]  ;;  %v499_v13 = vld [vmem:[#allocation8 + $0x188] sm:$0xff]  ;;  %v1480_v15 = vpack.c.bf16 %v488_v7, %v484_v6 }
  0x6c   :  { %1341 = vmatpush1.bf16.msra.mxu0 %v1340_v33  ;;  %v497_v10 = vld [vmem:[#allocation8 + $0x178] sm:$0xff]  ;;  %v494_v12 = vld [vmem:[#allocation8 + $0x160] sm:$0xff]  ;;  %v503_v14 = vld [vmem:[#allocation8 + $0x1a8] sm:$0xff] }
  0x6d   :  { %1343 = vmatprep.subr.bf16.mxu0 %v1342_v37  ;;  %v1482_v16 = vpack.c.bf16 %v497_v10, %v493_v8  ;;  %v1356_v17 = vpack.c.bf16 %v494_v12, %v490_v11  ;;  %v492_v18 = vld [vmem:[#allocation8 + $0x150] sm:$0xff]  ;;  %v501_v20 = vld [vmem:[#allocation8 + $0x198] sm:$0xff]  ;;  %v1358_v21 = vpack.c.bf16 %v503_v14, %v499_v13  ;;  %v498_v23 = vld [vmem:[#allocation8 + $0x180] sm:$0xff] }
  0x6e   :  { %1469 = vmatpush1.bf16.msra.mxu1 %v1468_v43  ;;  %v496_v19 = vld [vmem:[#allocation8 + $0x170] sm:$0xff]  ;;  %v505_v22 = vld [vmem:[#allocation8 + $0x1b8] sm:$0xff]  ;;  %v502_v24 = vld [vmem:[#allocation8 + $0x1a0] sm:$0xff] }
  0x6f   :  { %1471 = vmatprep.subr.bf16.mxu1 %v1470_v44  ;;  %v507_v25 = vld [vmem:[#allocation8 + $0x1c8] sm:$0xff]  ;;  %v1484_v27 = vpack.c.bf16 %v496_v19, %v492_v18  ;;  %v1486_v28 = vpack.c.bf16 %v505_v22, %v501_v20  ;;  %v1360_v29 = vpack.c.bf16 %v502_v24, %v498_v23  ;;  %v500_v30 = vld [vmem:[#allocation8 + $0x190] sm:$0xff]  ;;  %v509_v32 = vld [vmem:[#allocation8 + $0x1d8] sm:$0xff] }
  0x70   :  { %1345 = vmatpush1.bf16.msra.mxu0 %v1344_v45  ;;  %v511_v26 = vld [vmem:[#allocation8 + $0x1e8] sm:$0xff]  ;;  %v504_v31 = vld [vmem:[#allocation8 + $0x1b0] sm:$0xff]  ;;  %v513_v34 = vld [vmem:[#allocation8 + $0x1f8] sm:$0xff] }
  0x71   :  { %1347 = vmatprep.subr.bf16.mxu0 %v1346_v49  ;;  %v1362_v33 = vpack.c.bf16 %v511_v26, %v507_v25  ;;  %v506_v35 = vld [vmem:[#allocation8 + $0x1c0] sm:$0xff]  ;;  %v515_v37 = vld [vmem:[#allocation8 + $0x208] sm:$0xff]  ;;  %v1488_v39 = vpack.c.bf16 %v504_v31, %v500_v30  ;;  %v1490_v40 = vpack.c.bf16 %v513_v34, %v509_v32  ;;  %v508_v42 = vld [vmem:[#allocation8 + $0x1d0] sm:$0xff] }
  0x72   :  { %1473 = vmatpush1.bf16.msra.mxu1 %v1472_v55  ;;  %v510_v36 = vld [vmem:[#allocation8 + $0x1e0] sm:$0xff]  ;;  %v519_v38 = vld [vmem:[#allocation8 + $0x228] sm:$0xff]  ;;  %v512_v43 = vld [vmem:[#allocation8 + $0x1f0] sm:$0xff] }
  0x73   :  { %1475 = vmatprep.subr.bf16.mxu1 %v1474_v56  ;;  %v1364_v41 = vpack.c.bf16 %v510_v36, %v506_v35  ;;  %v517_v44 = vld [vmem:[#allocation8 + $0x218] sm:$0xff]  ;;  %v1366_v45 = vpack.c.bf16 %v519_v38, %v515_v37  ;;  %v514_v47 = vld [vmem:[#allocation8 + $0x200] sm:$0xff]  ;;  %v523_v49 = vld [vmem:[#allocation8 + $0x248] sm:$0xff]  ;;  %v1492_v51 = vpack.c.bf16 %v512_v43, %v508_v42 }
  0x74   :  { %1349 = vmatpush1.bf16.msra.mxu0 %v1348_v57  ;;  %v521_v46 = vld [vmem:[#allocation8 + $0x238] sm:$0xff]  ;;  %v518_v48 = vld [vmem:[#allocation8 + $0x220] sm:$0xff]  ;;  %v527_v50 = vld [vmem:[#allocation8 + $0x268] sm:$0xff] }
  0x75   :  { %1351 = vmatprep.subr.bf16.mxu0 %v1350_v61  ;;  %v1494_v52 = vpack.c.bf16 %v521_v46, %v517_v44  ;;  %v1368_v53 = vpack.c.bf16 %v518_v48, %v514_v47  ;;  %v516_v54 = vld [vmem:[#allocation8 + $0x210] sm:$0xff]  ;;  %v525_v56 = vld [vmem:[#allocation8 + $0x258] sm:$0xff]  ;;  %v1370_v57 = vpack.c.bf16 %v527_v50, %v523_v49  ;;  %v522_v59 = vld [vmem:[#allocation8 + $0x240] sm:$0xff] }
  0x76   :  { %1477 = vmatpush1.bf16.msra.mxu1 %v1476_v3  ;;  %v520_v55 = vld [vmem:[#allocation8 + $0x230] sm:$0xff]  ;;  %v529_v58 = vld [vmem:[#allocation8 + $0x278] sm:$0xff]  ;;  %v526_v60 = vld [vmem:[#allocation8 + $0x260] sm:$0xff] }
  0x77   :  { %1479 = vmatprep.subr.bf16.mxu1 %v1478_v4  ;;  %v531_v61 = vld [vmem:[#allocation8 + $0x288] sm:$0xff]  ;;  %v1496_v63 = vpack.c.bf16 %v520_v55, %v516_v54  ;;  %v1498_v0 = vpack.c.bf16 %v529_v58, %v525_v56  ;;  %v1372_v1 = vpack.c.bf16 %v526_v60, %v522_v59  ;;  %v524_v2 = vld [vmem:[#allocation8 + $0x250] sm:$0xff]  ;;  %v533_v4 = vld [vmem:[#allocation8 + $0x298] sm:$0xff] }
  0x78   :  { %1353 = vmatpush1.bf16.msra.mxu0 %v1352_v5  ;;  %v535_v62 = vld [vmem:[#allocation8 + $0x2a8] sm:$0xff]  ;;  %v528_v3 = vld [vmem:[#allocation8 + $0x270] sm:$0xff]  ;;  %v537_v6 = vld [vmem:[#allocation8 + $0x2b8] sm:$0xff] }
  0x79   :  { %1355 = vmatprep.subr.bf16.mxu0 %v1354_v9  ;;  %v1374_v5 = vpack.c.bf16 %v535_v62, %v531_v61  ;;  %v530_v7 = vld [vmem:[#allocation8 + $0x280] sm:$0xff]  ;;  %v539_v9 = vld [vmem:[#allocation8 + $0x2c8] sm:$0xff]  ;;  %v1500_v11 = vpack.c.bf16 %v528_v3, %v524_v2  ;;  %v1502_v12 = vpack.c.bf16 %v537_v6, %v533_v4  ;;  %v532_v14 = vld [vmem:[#allocation8 + $0x290] sm:$0xff] }
  0x7a   :  { %1481 = vmatpush1.bf16.msra.mxu1 %v1480_v15  ;;  %v534_v8 = vld [vmem:[#allocation8 + $0x2a0] sm:$0xff]  ;;  %v543_v10 = vld [vmem:[#allocation8 + $0x2e8] sm:$0xff]  ;;  %v536_v15 = vld [vmem:[#allocation8 + $0x2b0] sm:$0xff] }
  0x7b   :  { %1483 = vmatprep.subr.bf16.mxu1 %v1482_v16  ;;  %v1376_v13 = vpack.c.bf16 %v534_v8, %v530_v7  ;;  %v541_v16 = vld [vmem:[#allocation8 + $0x2d8] sm:$0xff]  ;;  %v538_v19 = vld [vmem:[#allocation8 + $0x2c0] sm:$0xff]  ;;  %v551_v22 = vld [vmem:[#allocation8 + $0x328] sm:$0xff]  ;;  %v1504_v23 = vpack.c.bf16 %v536_v15, %v532_v14 }
  0x7c   :  { %1357 = vmatpush1.bf16.msra.mxu0 %v1356_v17  ;;  %v1378_v17 = vpack.c.bf16 %v543_v10, %v539_v9  ;;  %v545_v18 = vld [vmem:[#allocation8 + $0x2f8] sm:$0xff]  ;;  %v542_v20 = vld [vmem:[#allocation8 + $0x2e0] sm:$0xff]  ;;  %v540_v26 = vld [vmem:[#allocation8 + $0x2d0] sm:$0xff] }
  0x7d   :  { %1359 = vmatprep.subr.bf16.mxu0 %v1358_v21  ;;  %v547_v21 = vld [vmem:[#allocation8 + $0x308] sm:$0xff]  ;;  %v1506_v24 = vpack.c.bf16 %v545_v18, %v541_v16  ;;  %v1380_v25 = vpack.c.bf16 %v542_v20, %v538_v19  ;;  %v553_v30 = vld [vmem:[#allocation8 + $0x338] sm:$0xff]  ;;  %v546_v31 = vld [vmem:[#allocation8 + $0x300] sm:$0xff] }
  0x7e   :  { %1485 = vmatpush1.bf16.msra.mxu1 %v1484_v27  ;;  %v544_v27 = vld [vmem:[#allocation8 + $0x2f0] sm:$0xff]  ;;  %v550_v32 = vld [vmem:[#allocation8 + $0x320] sm:$0xff]  ;;  %v559_v34 = vld [vmem:[#allocation8 + $0x368] sm:$0xff] }
  0x7f   :  { %1487 = vmatprep.subr.bf16.mxu1 %v1486_v28  ;;  %v549_v28 = vld [vmem:[#allocation8 + $0x318] sm:$0xff]  ;;  %v1508_v35 = vpack.c.bf16 %v544_v27, %v540_v26  ;;  %v1384_v37 = vpack.c.bf16 %v550_v32, %v546_v31  ;;  %v548_v38 = vld [vmem:[#allocation8 + $0x310] sm:$0xff]  ;;  %v554_v43 = vld [vmem:[#allocation8 + $0x340] sm:$0xff] }
  0x80   :  { %1361 = vmatpush1.bf16.msra.mxu0 %v1360_v29  ;;  %v1382_v29 = vpack.c.bf16 %v551_v22, %v547_v21  ;;  %v1510_v36 = vpack.c.bf16 %v553_v30, %v549_v28  ;;  %v561_v42 = vld [vmem:[#allocation8 + $0x378] sm:$0xff]  ;;  %v558_v44 = vld [vmem:[#allocation8 + $0x360] sm:$0xff]  ;;  %v567_v46 = vld [vmem:[#allocation8 + $0x3a8] sm:$0xff] }
  0x81   :  { %1363 = vmatprep.subr.bf16.mxu0 %v1362_v33  ;;  %v555_v33 = vld [vmem:[#allocation8 + $0x348] sm:$0xff]  ;;  %v1388_v49 = vpack.c.bf16 %v558_v44, %v554_v43  ;;  %v556_v50 = vld [vmem:[#allocation8 + $0x350] sm:$0xff]  ;;  %v569_v54 = vld [vmem:[#allocation8 + $0x3b8] sm:$0xff] }
  0x82   :  { %1489 = vmatpush1.bf16.msra.mxu1 %v1488_v39  ;;  %v552_v39 = vld [vmem:[#allocation8 + $0x330] sm:$0xff]  ;;  %v562_v55 = vld [vmem:[#allocation8 + $0x380] sm:$0xff]  ;;  %v577_v3 = vld [vmem:[#allocation8 + $0x3f8] sm:$0xff] }
  0x83   :  { %1491 = vmatprep.subr.bf16.mxu1 %v1490_v40  ;;  %v557_v40 = vld [vmem:[#allocation8 + $0x358] sm:$0xff]  ;;  %v1512_v47 = vpack.c.bf16 %v552_v39, %v548_v38  ;;  %v566_v56 = vld [vmem:[#allocation8 + $0x3a0] sm:$0xff]  ;;  %v564_v60 = vld [vmem:[#allocation8 + $0x390] sm:$0xff] }
  0x84   :  { %1365 = vmatpush1.bf16.msra.mxu0 %v1364_v41  ;;  %v1386_v41 = vpack.c.bf16 %v559_v34, %v555_v33  ;;  %v1514_v48 = vpack.c.bf16 %v561_v42, %v557_v40  ;;  %v1392_v59 = vpack.c.bf16 %v566_v56, %v562_v55  ;;  %v568_v61 = vld [vmem:[#allocation8 + $0x3b0] sm:$0xff]  ;;  %v570_v4 = vld [vmem:[#allocation8 + $0x3c0] sm:$0xff]  ;;  %v585_v15 = vld [vmem:[#allocation8 + $0x438] sm:$0xff] }
  0x85   :  { %1367 = vmatprep.subr.bf16.mxu0 %v1366_v45  ;;  %v563_v45 = vld [vmem:[#allocation8 + $0x388] sm:$0xff]  ;;  %v1520_v62 = vpack.c.bf16 %v568_v61, %v564_v60  ;;  %v572_v8 = vld [vmem:[#allocation8 + $0x3d0] sm:$0xff]  ;;  %v1954_v20 = vld [vmem:[%s1995_s6] sm:$0x77] }
  0x86   :  { %1493 = vmatpush1.bf16.msra.mxu1 %v1492_v51  ;;  %v560_v51 = vld [vmem:[#allocation8 + $0x370] sm:$0xff]  ;;  %v578_v30 = vld [vmem:[#allocation8 + $0x400] sm:$0xff]  ;;  %v591_v40 = vld [vmem:[#allocation8 + $0x468] sm:$0xff] }
  0x87   :  { %1495 = vmatprep.subr.bf16.mxu1 %v1494_v52  ;;  %v565_v52 = vld [vmem:[#allocation8 + $0x398] sm:$0xff]  ;;  %v576_v9 = vld [vmem:[#allocation8 + $0x3f0] sm:$0xff]  ;;  %v582_v31 = vld [vmem:[#allocation8 + $0x420] sm:$0xff] }
  0x88   :  { %1369 = vmatpush1.bf16.msra.mxu0 %v1368_v53  ;;  %v1390_v53 = vpack.c.bf16 %v567_v46, %v563_v45  ;;  %v1518_v58 = vpack.c.bf16 %v569_v54, %v565_v52  ;;  %v1524_v10 = vpack.c.bf16 %v576_v9, %v572_v8  ;;  %v593_v42 = vld [vmem:[#allocation8 + $0x478] sm:$0xff]  ;;  %v1400_v45 = vpack.c.bf16 %v582_v31, %v578_v30  ;;  %v588_v54 = vld [vmem:[#allocation8 + $0x450] sm:$0xff]  ;;  %v595_v56 = vld [vmem:[#allocation8 + $0x488] sm:$0xff] }
  0x89   :  { %1371 = vmatprep.subr.bf16.mxu0 %v1370_v57  ;;  %v1516_v57 = vpack.c.bf16 %v560_v51, %v556_v50  ;;  %v592_v55 = vld [vmem:[#allocation8 + $0x470] sm:$0xff]  ;;  %v601_v60 = vld [vmem:[#allocation8 + $0x4b8] sm:$0xff] }
  0x8a   :  { %1497 = vmatpush1.bf16.msra.mxu1 %v1496_v63  ;;  %v571_v63 = vld [vmem:[#allocation8 + $0x3c8] sm:$0xff]  ;;  %v605_v8 = vld [vmem:[#allocation8 + $0x4d8] sm:$0xff]  ;;  %v612_v31 = vld [vmem:[#allocation8 + $0x510] sm:$0xff] }
  0x8b   :  { %1499 = vmatprep.subr.bf16.mxu1 %v1498_v0  ;;  %v575_v0 = vld [vmem:[#allocation8 + $0x3e8] sm:$0xff]  ;;  %v609_v9 = vld [vmem:[#allocation8 + $0x4f8] sm:$0xff] }
  0x8c   :  { %1373 = vmatpush1.bf16.msra.mxu0 %v1372_v1  ;;  %v573_v1 = vld [vmem:[#allocation8 + $0x3d8] sm:$0xff]  ;;  %v1394_v2 = vpack.c.bf16 %v575_v0, %v571_v63  ;;  %v1532_v63 = vpack.c.bf16 %v592_v55, %v588_v54  ;;  %v594_v0 = vld [vmem:[#allocation8 + $0x480] sm:$0xff] }
  0x8d   :  { %1375 = vmatprep.subr.bf16.mxu0 %v1374_v5  ;;  %v574_v5 = vld [vmem:[#allocation8 + $0x3e0] sm:$0xff]  ;;  %v1522_v6 = vpack.c.bf16 %v577_v3, %v573_v1 }
  0x8e   :  { %1501 = vmatpush1.bf16.msra.mxu1 %v1500_v11  ;;  %v1396_v7 = vpack.c.bf16 %v574_v5, %v570_v4  ;;  %v579_v11 = vld [vmem:[#allocation8 + $0x408] sm:$0xff]  ;;  %v598_v1 = vld [vmem:[#allocation8 + $0x4a0] sm:$0xff]  ;;  %v596_v4 = vld [vmem:[#allocation8 + $0x490] sm:$0xff] }
  0x8f   :  { %1503 = vmatprep.subr.bf16.mxu1 %v1502_v12  ;;  %v583_v12 = vld [vmem:[#allocation8 + $0x428] sm:$0xff]  ;;  %v600_v5 = vld [vmem:[#allocation8 + $0x4b0] sm:$0xff] }
  0x90   :  { %1377 = vmatpush1.bf16.msra.mxu0 %v1376_v13  ;;  %v581_v13 = vld [vmem:[#allocation8 + $0x418] sm:$0xff]  ;;  %v1398_v14 = vpack.c.bf16 %v583_v12, %v579_v11  ;;  %v1536_v11 = vpack.c.bf16 %v600_v5, %v596_v4  ;;  %v602_v12 = vld [vmem:[#allocation8 + $0x4c0] sm:$0xff]  ;;  %v636_v4 = vld [vmem:[#allocation8 + $0x5d0] sm:$0xff] }
  0x91   :  { %1379 = vmatprep.subr.bf16.mxu0 %v1378_v17  ;;  %v1526_v16 = vpack.c.bf16 %v585_v15, %v581_v13  ;;  %v406_v17 = vlaneseq  ;;  %v606_v13 = vld [vmem:[#allocation8 + $0x4e0] sm:$0xff]  ;;  %v1538_v15 = vpack.c.bf16 %v609_v9, %v605_v8  ;;  %v640_v5 = vld [vmem:[#allocation8 + $0x5f0] sm:$0xff]  ;;  %v645_v8 = vld [vmem:[#allocation8 + $0x618] sm:$0xff] }
  0x92   :  { %1505 = vmatpush1.bf16.msra.mxu1 %v1504_v23  ;;  %v1961_v23 = vld [vmem:[%s1995_s6 + $0x8] sm:$0x77]  ;;  %v649_v9 = vld [vmem:[#allocation8 + $0x638] sm:$0xff]  ;;  %s1829_s6 = smov [#allocation11]  }
  0x93   :  { %1507 = vmatprep.subr.bf16.mxu1 %v1506_v24  ;;  %v1948_v18 = vshrl.u32 %v406_v17, 7  ;;  %v608_v17 = vld [vmem:[#allocation8 + $0x4f0] sm:$0xff]  ;;  %s1245_s17 = sshll.u32 %s1829_s6, 4  ;;  %s1246_s17 = int_to_ptr.vmem [resolvable:$true] %s1245_s17 }
  0x94   :  { %1381 = vmatpush1.bf16.msra.mxu0 %v1380_v25  ;;  %s1789_s18 = scalar_lea.vmem %s1246_s17, 32  ;;  %p1794_p13 = scmp.lt.s32.totalorder %s1246_s17, %s1246_s17 }
  0x95   :  { %1383 = vmatprep.subr.bf16.mxu0 %v1382_v29  ;;  %v408_v19 = vsub.s32 0, %v1948_v18  ;;  %v412_v21 = vsub.s32 4, %v1948_v18  ;;  %p1790_p12 = scmp.ne.s32.totalorder %s1246_s17, %s1789_s18  ;;  %p1795_p0 = scmp.lt.s32.totalorder %s1789_s18, %s1789_s18 }
  0x96   :  { %1509 = vmatpush1.bf16.msra.mxu1 %v1508_v35  ;;  %v580_v35 = vld [vmem:[#allocation8 + $0x410] sm:$0xff] }
  0x97   :  { %1511 = vmatprep.subr.bf16.mxu1 %v1510_v36  ;;  %v409_v22 = vrot.slane %v1954_v20, %v408_v19  ;;  %v413_v24 = vrot.slane %v1954_v20, %v412_v21  ;;  %v417_v25 = vrot.slane %v1961_v23, %v408_v19  ;;  %v421_v27 = vrot.slane %v1961_v23, %v412_v21  ;;  %v584_v36 = vld [vmem:[#allocation8 + $0x430] sm:$0xff]  ;;  %v615_v21 = vld [vmem:[#allocation8 + $0x528] sm:$0xff]  ;;  %p1796_p1 = por %p1795_p0, %p1794_p13 }
  0x98   :  { %1385 = vmatpush1.bf16.msra.mxu0 %v1384_v37  ;;  %v587_v37 = vld [vmem:[#allocation8 + $0x448] sm:$0xff]  ;;  %v1528_v46 = vpack.c.bf16 %v584_v36, %v580_v35  ;;  %v621_v35 = vld [vmem:[#allocation8 + $0x558] sm:$0xff] }
  0x99   :  { %1387 = vmatprep.subr.bf16.mxu0 %v1386_v41  ;;  %v429_v26 = vrot.slane %v409_v22, %v408_v19  ;;  %v433_v28 = vrot.slane %v413_v24, %v408_v19  ;;  %v437_v32 = vrot.slane %v417_v25, %v408_v19  ;;  %v441_v38 = vrot.slane %v421_v27, %v408_v19  ;;  %v589_v41 = vld [vmem:[#allocation8 + $0x458] sm:$0xff]  ;;  %v611_v19 = vld [vmem:[#allocation8 + $0x508] sm:$0xff]  ;;  %v610_v27 = vld [vmem:[#allocation8 + $0x500] sm:$0xff]  ;;  %p1797_p2 = pnand %p1796_p1, %p1790_p12 }
  0x9a   :  { %1513 = vmatpush1.bf16.msra.mxu1 %v1512_v47  ;;  %v586_v47 = vld [vmem:[#allocation8 + $0x440] sm:$0xff]  ;;  %v1402_v52 = vpack.c.bf16 %v591_v40, %v587_v37  ;;  %v613_v22 = vld [vmem:[#allocation8 + $0x518] sm:$0xff]  ;;  %v1412_v25 = vpack.c.bf16 %v606_v13, %v602_v12 }
  0x9b   :  { %1515 = vmatprep.subr.bf16.mxu1 %v1514_v48  ;;  %v590_v48 = vld [vmem:[#allocation8 + $0x460] sm:$0xff]  ;;  %v617_v24 = vld [vmem:[#allocation8 + $0x538] sm:$0xff] }
  0x9c   :  { %1389 = vmatpush1.bf16.msra.mxu0 %v1388_v49  ;;  %v1542_v30 = vpack.c.bf16 %v617_v24, %v613_v22  ;;  %v625_v36 = vld [vmem:[#allocation8 + $0x578] sm:$0xff]  ;;  %v622_v40 = vld [vmem:[#allocation8 + $0x560] sm:$0xff] }
  0x9d   :  { %1391 = vmatprep.subr.bf16.mxu0 %v1390_v53  ;;  %v1530_v53 = vpack.c.bf16 %v593_v42, %v589_v41  ;;  %v1546_v42 = vpack.c.bf16 %v625_v36, %v621_v35  ;;  %v642_v12 = vld [vmem:[#allocation8 + $0x600] sm:$0xff]  ;;  %v653_v22 = vld [vmem:[#allocation8 + $0x658] sm:$0xff] }
  0x9e   :  { %1517 = vmatpush1.bf16.msra.mxu1 %v1516_v57  ;;  %v646_v13 = vld [vmem:[#allocation8 + $0x620] sm:$0xff]  ;;  %v657_v24 = vld [vmem:[#allocation8 + $0x678] sm:$0xff] }
  0x9f   :  { %1519 = vmatprep.subr.bf16.mxu1 %v1518_v58  ;;  %v599_v58 = vld [vmem:[#allocation8 + $0x4a8] sm:$0xff]  ;;  %v661_v35 = vld [vmem:[#allocation8 + $0x698] sm:$0xff] }
  0xa0   :  { %1393 = vmatpush1.bf16.msra.mxu0 %v1392_v59  ;;  %v597_v59 = vld [vmem:[#allocation8 + $0x498] sm:$0xff] }
  0xa1   :  { %1395 = vmatprep.subr.bf16.mxu0 %v1394_v2  ;;  %v1406_v2 = vpack.c.bf16 %v599_v58, %v595_v56  ;;  %v1534_v3 = vpack.c.bf16 %v601_v60, %v597_v59  ;;  %v628_v56 = vld [vmem:[#allocation8 + $0x590] sm:$0xff]  ;;  %v635_v58 = vld [vmem:[#allocation8 + $0x5c8] sm:$0xff]  ;;  %v637_v60 = vld [vmem:[#allocation8 + $0x5d8] sm:$0xff] }
  0xa2   :  { %1521 = vmatpush1.bf16.msra.mxu1 %v1520_v62  ;;  %v1404_v62 = vpack.c.bf16 %v590_v48, %v586_v47  ;;  %v629_v47 = vld [vmem:[#allocation8 + $0x598] sm:$0xff]  ;;  %v639_v59 = vld [vmem:[#allocation8 + $0x5e8] sm:$0xff] }
  0xa3   :  { %1523 = vmatprep.subr.bf16.mxu1 %v1522_v6  ;;  %v603_v6 = vld [vmem:[#allocation8 + $0x4c8] sm:$0xff]  ;;  %v633_v48 = vld [vmem:[#allocation8 + $0x5b8] sm:$0xff] }
  0xa4   :  { %1397 = vmatpush1.bf16.msra.mxu0 %v1396_v7  ;;  %v607_v7 = vld [vmem:[#allocation8 + $0x4e8] sm:$0xff]  ;;  %v1550_v55 = vpack.c.bf16 %v633_v48, %v629_v47  ;;  %v665_v36 = vld [vmem:[#allocation8 + $0x6b8] sm:$0xff] }
  0xa5   :  { %1399 = vmatprep.subr.bf16.mxu0 %v1398_v14  ;;  %v1410_v14 = vpack.c.bf16 %v607_v7, %v603_v6  ;;  %v643_v6 = vld [vmem:[#allocation8 + $0x608] sm:$0xff]  ;;  %v669_v47 = vld [vmem:[#allocation8 + $0x6d8] sm:$0xff] }
  0xa6   :  { %1525 = vmatpush1.bf16.msra.mxu1 %v1524_v10  ;;  %v1408_v10 = vpack.c.bf16 %v598_v1, %v594_v0  ;;  %v634_v0 = vld [vmem:[#allocation8 + $0x5c0] sm:$0xff]  ;;  %v647_v7 = vld [vmem:[#allocation8 + $0x628] sm:$0xff]  ;;  %v673_v48 = vld [vmem:[#allocation8 + $0x6f8] sm:$0xff] }
  0xa7   :  { %1527 = vmatprep.subr.bf16.mxu1 %v1526_v16  ;;  %v604_v16 = vld [vmem:[#allocation8 + $0x4d0] sm:$0xff]  ;;  %v638_v1 = vld [vmem:[#allocation8 + $0x5e0] sm:$0xff] }
 0x13a   :  { %v328_v29 = vpop.f32.mrb[0].mxu0 }
 0x13b   :  { %v442_v33 = vadd.f32 %v429_v26, %v328_v29  ;;  %v330_v34 = vpop.f32.mrb[1].mxu0  ;;  %v1540_v26 = vpack.c.bf16 %v608_v17, %v604_v16  ;;  %v1414_v29 = vpack.c.bf16 %v615_v21, %v611_v19  ;;  %v644_v16 = vld [vmem:[#allocation8 + $0x610] sm:$0xff]  ;;  %v651_v19 = vld [vmem:[#allocation8 + $0x648] sm:$0xff] }
 0x13c   :  { %v443_v39 = vadd.f32 %v433_v28, %v330_v34  ;;  %v399_v43 = vpop.f32.mrb[0].mxu1  ;;  %v614_v28 = vld [vmem:[#allocation8 + $0x520] sm:$0xff]  ;;  %v623_v34 = vld [vmem:[#allocation8 + $0x568] sm:$0xff]  ;;  %v648_v17 = vld [vmem:[#allocation8 + $0x630] sm:$0xff] }
 0x13d   :  { %v1966_v49 = vadd.f32 %v437_v32, %v399_v43  ;;  %v401_v50 = vpop.f32.mrb[1].mxu1  ;;  %v446_v51 = vmax.f32 %v442_v33, 0.0  ;;  %v616_v32 = vld [vmem:[#allocation8 + $0x530] sm:$0xff]  ;;  %v619_v33 = vld [vmem:[#allocation8 + $0x548] sm:$0xff]  ;;  %v1416_v37 = vpack.c.bf16 %v614_v28, %v610_v27  ;;  %v650_v27 = vld [vmem:[#allocation8 + $0x640] sm:$0xff] }
 0x13e   :  { %v447_v44 = vmax.f32 %v443_v39, 0.0  ;;  %v445_v57 = vadd.f32 %v441_v38, %v401_v50  ;;  %v1544_v38 = vpack.c.bf16 %v616_v32, %v612_v31  ;;  %v618_v39 = vld [vmem:[#allocation8 + $0x540] sm:$0xff]  ;;  %v1418_v41 = vpack.c.bf16 %v623_v34, %v619_v33  ;;  %v620_v43 = vld [vmem:[#allocation8 + $0x550] sm:$0xff]  ;;  %v655_v21 = vld [vmem:[#allocation8 + $0x668] sm:$0xff] }
 0x13f   :  { %v1420_v50 = vpack.c.bf16 %v622_v40, %v618_v39  ;;  %v654_v28 = vld [vmem:[#allocation8 + $0x660] sm:$0xff]  ;;  %v652_v31 = vld [vmem:[#allocation8 + $0x650] sm:$0xff]  ;;  %v659_v33 = vld [vmem:[#allocation8 + $0x688] sm:$0xff] }
 0x140   :  { %806 = vmatprep.mubr.f32.mxu0 %v447_v44  ;;  %948 = vmatprep.mubr.f32.mxu1 %v447_v44  ;;  %v449_v61 = vmax.f32 %v445_v57, 0.0  ;;  %v624_v44 = vld [vmem:[#allocation8 + $0x570] sm:$0xff]  ;;  %v663_v34 = vld [vmem:[#allocation8 + $0x6a8] sm:$0xff]  ;;  %v658_v39 = vld [vmem:[#allocation8 + $0x680] sm:$0xff] }
 0x141   :  { %807 = vmatmul.mubr.f32.vlgmr.msra.gmra.mrb[2].mxu0 %v446_v51  ;;  %949 = vmatmul.mubr.f32.vlgmr.msra.gmra.mrb[2].mxu1 %v446_v51  ;;  %v1548_v51 = vpack.c.bf16 %v624_v44, %v620_v43  ;;  %v632_v57 = vld [vmem:[#allocation8 + $0x5b0] sm:$0xff]  ;;  %v662_v40 = vld [vmem:[#allocation8 + $0x6a0] sm:$0xff] }
 0x142   :  { %1401 = vmatpush1.bf16.msra.mxu0 %v1400_v45  ;;  %1529 = vmatpush1.bf16.msra.mxu1 %v1528_v46  ;;  %v627_v45 = vld [vmem:[#allocation8 + $0x588] sm:$0xff]  ;;  %v656_v32 = vld [vmem:[#allocation8 + $0x670] sm:$0xff] }
 0x143   :  { %1403 = vmatprep.subr.bf16.mxu0 %v1402_v52  ;;  %1531 = vmatprep.subr.bf16.mxu1 %v1530_v53  ;;  %v631_v46 = vld [vmem:[#allocation8 + $0x5a8] sm:$0xff]  ;;  %v626_v52 = vld [vmem:[#allocation8 + $0x580] sm:$0xff]  ;;  %v660_v43 = vld [vmem:[#allocation8 + $0x690] sm:$0xff] }
 0x144   :  { %877 = vmatprep.mubr.f32.mxu0 %v449_v61  ;;  %1019 = vmatprep.mubr.f32.mxu1 %v449_v61  ;;  %v630_v53 = vld [vmem:[#allocation8 + $0x5a0] sm:$0xff]  ;;  %v1422_v54 = vpack.c.bf16 %v631_v46, %v627_v45  ;;  %v641_v61 = vld [vmem:[#allocation8 + $0x5f8] sm:$0xff]  ;;  %v664_v44 = vld [vmem:[#allocation8 + $0x6b0] sm:$0xff] }
 0x145   :  { %v667_v45 = vld [vmem:[#allocation8 + $0x6c8] sm:$0xff] }
 0x146   :  { %1405 = vmatpush1.bf16.msra.mxu0 %v1404_v62  ;;  %1533 = vmatpush1.bf16.msra.mxu1 %v1532_v63  ;;  %v1424_v62 = vpack.c.bf16 %v630_v53, %v626_v52  ;;  %v1552_v63 = vpack.c.bf16 %v632_v57, %v628_v56  ;;  %v671_v46 = vld [vmem:[#allocation8 + $0x6e8] sm:$0xff]  ;;  %v666_v52 = vld [vmem:[#allocation8 + $0x6c0] sm:$0xff]  ;;  %v668_v56 = vld [vmem:[#allocation8 + $0x6d0] sm:$0xff] }
 0x147   :  { %1407 = vmatprep.subr.bf16.mxu0 %v1406_v2  ;;  %1535 = vmatprep.subr.bf16.mxu1 %v1534_v3  ;;  %v1426_v2 = vpack.c.bf16 %v639_v59, %v635_v58  ;;  %v1554_v3 = vpack.c.bf16 %v641_v61, %v637_v60  ;;  %v670_v53 = vld [vmem:[#allocation8 + $0x6e0] sm:$0xff]  ;;  %v672_v57 = vld [vmem:[#allocation8 + $0x6f0] sm:$0xff]  ;;  %v675_v58 = vld [vmem:[#allocation8 + $0x708] sm:$0xff] }
 0x148   :  { %v679_v59 = vld [vmem:[#allocation8 + $0x728] sm:$0xff]  ;;  %v677_v60 = vld [vmem:[#allocation8 + $0x718] sm:$0xff] }
 0x149   :  { %v681_v61 = vld [vmem:[#allocation8 + $0x738] sm:$0xff] }
 0x14a   :  { %1409 = vmatpush1.bf16.msra.mxu0 %v1408_v10  ;;  %1537 = vmatpush1.bf16.msra.mxu1 %v1536_v11  ;;  %v1428_v10 = vpack.c.bf16 %v638_v1, %v634_v0  ;;  %v1556_v11 = vpack.c.bf16 %v640_v5, %v636_v4  ;;  %v674_v0 = vld [vmem:[#allocation8 + $0x700] sm:$0xff]  ;;  %v676_v4 = vld [vmem:[#allocation8 + $0x710] sm:$0xff] }
 0x14b   :  { %1411 = vmatprep.subr.bf16.mxu0 %v1410_v14  ;;  %1539 = vmatprep.subr.bf16.mxu1 %v1538_v15  ;;  %v1430_v14 = vpack.c.bf16 %v647_v7, %v643_v6  ;;  %v1558_v15 = vpack.c.bf16 %v649_v9, %v645_v8  ;;  %v678_v1 = vld [vmem:[#allocation8 + $0x720] sm:$0xff]  ;;  %v680_v5 = vld [vmem:[#allocation8 + $0x730] sm:$0xff]  ;;  %v683_v6 = vld [vmem:[#allocation8 + $0x748] sm:$0xff] }
 0x14c   :  { %v687_v7 = vld [vmem:[#allocation8 + $0x768] sm:$0xff]  ;;  %v685_v8 = vld [vmem:[#allocation8 + $0x758] sm:$0xff] }
 0x14d   :  { %v689_v9 = vld [vmem:[#allocation8 + $0x778] sm:$0xff] }
 0x14e   :  { %1413 = vmatpush1.bf16.msra.mxu0 %v1412_v25  ;;  %1541 = vmatpush1.bf16.msra.mxu1 %v1540_v26  ;;  %v1432_v25 = vpack.c.bf16 %v646_v13, %v642_v12  ;;  %v1560_v26 = vpack.c.bf16 %v648_v17, %v644_v16  ;;  %v682_v12 = vld [vmem:[#allocation8 + $0x740] sm:$0xff]  ;;  %v684_v16 = vld [vmem:[#allocation8 + $0x750] sm:$0xff] }
 0x14f   :  { %1415 = vmatprep.subr.bf16.mxu0 %v1414_v29  ;;  %1543 = vmatprep.subr.bf16.mxu1 %v1542_v30  ;;  %v1434_v29 = vpack.c.bf16 %v655_v21, %v651_v19  ;;  %v1562_v30 = vpack.c.bf16 %v657_v24, %v653_v22  ;;  %v686_v13 = vld [vmem:[#allocation8 + $0x760] sm:$0xff]  ;;  %v688_v17 = vld [vmem:[#allocation8 + $0x770] sm:$0xff]  ;;  %v691_v19 = vld [vmem:[#allocation8 + $0x788] sm:$0xff] }
 0x150   :  { %v695_v21 = vld [vmem:[#allocation8 + $0x7a8] sm:$0xff]  ;;  %v693_v22 = vld [vmem:[#allocation8 + $0x798] sm:$0xff] }
 0x151   :  { %v697_v24 = vld [vmem:[#allocation8 + $0x7b8] sm:$0xff] }
 0x152   :  { %1417 = vmatpush1.bf16.msra.mxu0 %v1416_v37  ;;  %1545 = vmatpush1.bf16.msra.mxu1 %v1544_v38  ;;  %v1436_v37 = vpack.c.bf16 %v654_v28, %v650_v27  ;;  %v1564_v38 = vpack.c.bf16 %v656_v32, %v652_v31  ;;  %v690_v27 = vld [vmem:[#allocation8 + $0x780] sm:$0xff]  ;;  %v692_v31 = vld [vmem:[#allocation8 + $0x790] sm:$0xff] }
 0x153   :  { %1419 = vmatprep.subr.bf16.mxu0 %v1418_v41  ;;  %1547 = vmatprep.subr.bf16.mxu1 %v1546_v42  ;;  %v1438_v41 = vpack.c.bf16 %v663_v34, %v659_v33  ;;  %v1566_v42 = vpack.c.bf16 %v665_v36, %v661_v35  ;;  %v694_v28 = vld [vmem:[#allocation8 + $0x7a0] sm:$0xff]  ;;  %v696_v32 = vld [vmem:[#allocation8 + $0x7b0] sm:$0xff]  ;;  %v699_v33 = vld [vmem:[#allocation8 + $0x7c8] sm:$0xff] }
 0x154   :  { %v703_v34 = vld [vmem:[#allocation8 + $0x7e8] sm:$0xff]  ;;  %v701_v35 = vld [vmem:[#allocation8 + $0x7d8] sm:$0xff] }
 0x155   :  { %v705_v36 = vld [vmem:[#allocation8 + $0x7f8] sm:$0xff] }
 0x156   :  { %1421 = vmatpush1.bf16.msra.mxu0 %v1420_v50  ;;  %1549 = vmatpush1.bf16.msra.mxu1 %v1548_v51  ;;  %v1440_v50 = vpack.c.bf16 %v662_v40, %v658_v39  ;;  %v1568_v51 = vpack.c.bf16 %v664_v44, %v660_v43  ;;  %v698_v39 = vld [vmem:[#allocation8 + $0x7c0] sm:$0xff]  ;;  %v700_v43 = vld [vmem:[#allocation8 + $0x7d0] sm:$0xff] }
 0x157   :  { %1423 = vmatprep.subr.bf16.mxu0 %v1422_v54  ;;  %1551 = vmatprep.subr.bf16.mxu1 %v1550_v55  ;;  %v1442_v54 = vpack.c.bf16 %v671_v46, %v667_v45  ;;  %v1570_v55 = vpack.c.bf16 %v673_v48, %v669_v47  ;;  %v702_v40 = vld [vmem:[#allocation8 + $0x7e0] sm:$0xff]  ;;  %v704_v44 = vld [vmem:[#allocation8 + $0x7f0] sm:$0xff]  ;;  %v1047_v46 = vld [vmem:[#allocation10 + $0x88] sm:$0xff] }
 0x158   :  { %v1046_v45 = vld [vmem:[#allocation10 + $0x80] sm:$0xff]  ;;  %v1079_v48 = vld [vmem:[#allocation10 + $0x188] sm:$0xff] }
 0x159   :  { %v1078_v47 = vld [vmem:[#allocation10 + $0x180] sm:$0xff] }
 0x15a   :  { %1425 = vmatpush1.bf16.msra.mxu0 %v1424_v62  ;;  %1553 = vmatpush1.bf16.msra.mxu1 %v1552_v63  ;;  %v1444_v62 = vpack.c.bf16 %v670_v53, %v666_v52  ;;  %v1572_v63 = vpack.c.bf16 %v672_v57, %v668_v56  ;;  %v1030_v52 = vld [vmem:[#allocation10] sm:$0xff]  ;;  %v1031_v53 = vld [vmem:[#allocation10 + $0x8] sm:$0xff] }
 0x15b   :  { %1427 = vmatprep.subr.bf16.mxu0 %v1426_v2  ;;  %1555 = vmatprep.subr.bf16.mxu1 %v1554_v3  ;;  %v1446_v2 = vpack.c.bf16 %v679_v59, %v675_v58  ;;  %v1574_v3 = vpack.c.bf16 %v681_v61, %v677_v60  ;;  %v1062_v56 = vld [vmem:[#allocation10 + $0x100] sm:$0xff]  ;;  %v1063_v57 = vld [vmem:[#allocation10 + $0x108] sm:$0xff]  ;;  %v1048_v58 = vld [vmem:[#allocation10 + $0x90] sm:$0xff] }
 0x15c   :  { %v1049_v59 = vld [vmem:[#allocation10 + $0x98] sm:$0xff]  ;;  %v1080_v60 = vld [vmem:[#allocation10 + $0x190] sm:$0xff] }
 0x15d   :  { %v1081_v61 = vld [vmem:[#allocation10 + $0x198] sm:$0xff] }
 0x15e   :  { %1429 = vmatpush1.bf16.msra.mxu0 %v1428_v10  ;;  %1557 = vmatpush1.bf16.msra.mxu1 %v1556_v11  ;;  %v1448_v10 = vpack.c.bf16 %v678_v1, %v674_v0  ;;  %v1576_v11 = vpack.c.bf16 %v680_v5, %v676_v4  ;;  %v1032_v0 = vld [vmem:[#allocation10 + $0x10] sm:$0xff]  ;;  %v1033_v1 = vld [vmem:[#allocation10 + $0x18] sm:$0xff]  ;;  %v1626_v4 = vpack.c.bf16 %v1081_v61, %v1080_v60  ;;  %v1090_v60 = vld [vmem:[#allocation10 + $0x1e0] sm:$0xff] }
 0x15f   :  { %1431 = vmatprep.subr.bf16.mxu0 %v1430_v14  ;;  %1559 = vmatprep.subr.bf16.mxu1 %v1558_v15  ;;  %v1450_v14 = vpack.c.bf16 %v687_v7, %v683_v6  ;;  %v1578_v15 = vpack.c.bf16 %v689_v9, %v685_v8  ;;  %v1064_v5 = vld [vmem:[#allocation10 + $0x110] sm:$0xff]  ;;  %v1065_v6 = vld [vmem:[#allocation10 + $0x118] sm:$0xff]  ;;  %v1050_v7 = vld [vmem:[#allocation10 + $0xa0] sm:$0xff] }
 0x160   :  { %v1051_v8 = vld [vmem:[#allocation10 + $0xa8] sm:$0xff]  ;;  %v1082_v9 = vld [vmem:[#allocation10 + $0x1a0] sm:$0xff] }
 0x161   :  { %v1091_v61 = vld [vmem:[#allocation10 + $0x1e8] sm:$0xff] }
 0x162   :  { %1433 = vmatpush1.bf16.msra.mxu0 %v1432_v25  ;;  %1561 = vmatpush1.bf16.msra.mxu1 %v1560_v26  ;;  %v1452_v25 = vpack.c.bf16 %v686_v13, %v682_v12  ;;  %v1580_v26 = vpack.c.bf16 %v688_v17, %v684_v16  ;;  %v1628_v12 = vpack.c.bf16 %v1065_v6, %v1064_v5  ;;  %v1034_v13 = vld [vmem:[#allocation10 + $0x20] sm:$0xff]  ;;  %v1067_v17 = vld [vmem:[#allocation10 + $0x128] sm:$0xff] }
 0x163   :  { %1435 = vmatprep.subr.bf16.mxu0 %v1434_v29  ;;  %1563 = vmatprep.subr.bf16.mxu1 %v1562_v30  ;;  %v1454_v29 = vpack.c.bf16 %v695_v21, %v691_v19  ;;  %v1582_v30 = vpack.c.bf16 %v697_v24, %v693_v22  ;;  %v1066_v16 = vld [vmem:[#allocation10 + $0x120] sm:$0xff]  ;;  %v1052_v19 = vld [vmem:[#allocation10 + $0xb0] sm:$0xff]  ;;  %v1053_v21 = vld [vmem:[#allocation10 + $0xb8] sm:$0xff] }
 0x164   :  { %v1084_v22 = vld [vmem:[#allocation10 + $0x1b0] sm:$0xff]  ;;  %v1085_v24 = vld [vmem:[#allocation10 + $0x1b8] sm:$0xff]  ;;  %v1075_v6 = vld [vmem:[#allocation10 + $0x168] sm:$0xff] }
 0x166   :  { %1437 = vmatpush1.bf16.msra.mxu0 %v1436_v37  ;;  %1565 = vmatpush1.bf16.msra.mxu1 %v1564_v38  ;;  %v1456_v37 = vpack.c.bf16 %v694_v28, %v690_v27  ;;  %v1584_v38 = vpack.c.bf16 %v696_v32, %v692_v31  ;;  %v1036_v27 = vld [vmem:[#allocation10 + $0x30] sm:$0xff]  ;;  %v1037_v28 = vld [vmem:[#allocation10 + $0x38] sm:$0xff] }
 0x167   :  { %1439 = vmatprep.subr.bf16.mxu0 %v1438_v41  ;;  %1567 = vmatprep.subr.bf16.mxu1 %v1566_v42  ;;  %v1458_v41 = vpack.c.bf16 %v703_v34, %v699_v33  ;;  %v1586_v42 = vpack.c.bf16 %v705_v36, %v701_v35  ;;  %v1068_v31 = vld [vmem:[#allocation10 + $0x130] sm:$0xff]  ;;  %v1069_v32 = vld [vmem:[#allocation10 + $0x138] sm:$0xff]  ;;  %v1054_v33 = vld [vmem:[#allocation10 + $0xc0] sm:$0xff] }
 0x168   :  { %v1055_v34 = vld [vmem:[#allocation10 + $0xc8] sm:$0xff]  ;;  %v1086_v35 = vld [vmem:[#allocation10 + $0x1c0] sm:$0xff] }
 0x169   :  { %v1087_v36 = vld [vmem:[#allocation10 + $0x1c8] sm:$0xff] }
 0x16a   :  { %1441 = vmatpush1.bf16.msra.mxu0 %v1440_v50  ;;  %1569 = vmatpush1.bf16.msra.mxu1 %v1568_v51  ;;  %v1460_v50 = vpack.c.bf16 %v702_v40, %v698_v39  ;;  %v1588_v51 = vpack.c.bf16 %v704_v44, %v700_v43  ;;  %v1038_v39 = vld [vmem:[#allocation10 + $0x40] sm:$0xff]  ;;  %v1039_v40 = vld [vmem:[#allocation10 + $0x48] sm:$0xff] }
 0x16b   :  { %1443 = vmatprep.subr.bf16.mxu0 %v1442_v54  ;;  %1571 = vmatprep.subr.bf16.mxu1 %v1570_v55  ;;  %v1590_v54 = vpack.c.bf16 %v1047_v46, %v1046_v45  ;;  %v1622_v55 = vpack.c.bf16 %v1079_v48, %v1078_v47  ;;  %v1070_v43 = vld [vmem:[#allocation10 + $0x140] sm:$0xff]  ;;  %v1071_v44 = vld [vmem:[#allocation10 + $0x148] sm:$0xff]  ;;  %v1056_v45 = vld [vmem:[#allocation10 + $0xd0] sm:$0xff] }
 0x16c   :  { %v1057_v46 = vld [vmem:[#allocation10 + $0xd8] sm:$0xff]  ;;  %v1088_v47 = vld [vmem:[#allocation10 + $0x1d0] sm:$0xff] }
 0x16d   :  { %v1089_v48 = vld [vmem:[#allocation10 + $0x1d8] sm:$0xff] }
 0x16e   :  { %1445 = vmatpush1.bf16.msra.mxu0 %v1444_v62  ;;  %1573 = vmatpush1.bf16.msra.mxu1 %v1572_v63  ;;  %v1592_v62 = vpack.c.bf16 %v1031_v53, %v1030_v52  ;;  %v1624_v63 = vpack.c.bf16 %v1063_v57, %v1062_v56  ;;  %v1040_v52 = vld [vmem:[#allocation10 + $0x50] sm:$0xff]  ;;  %v1041_v53 = vld [vmem:[#allocation10 + $0x58] sm:$0xff] }
 0x16f   :  { %1447 = vmatprep.subr.bf16.mxu0 %v1446_v2  ;;  %1575 = vmatprep.subr.bf16.mxu1 %v1574_v3  ;;  %v448_v2 = vmax.f32 %v1966_v49, 0.0  ;;  %v1594_v3 = vpack.c.bf16 %v1049_v59, %v1048_v58  ;;  %v1598_v49 = vpack.c.bf16 %v1051_v8, %v1050_v7  ;;  %v1072_v56 = vld [vmem:[#allocation10 + $0x150] sm:$0xff]  ;;  %v1073_v57 = vld [vmem:[#allocation10 + $0x158] sm:$0xff]  ;;  %v1058_v58 = vld [vmem:[#allocation10 + $0xe0] sm:$0xff] }
 0x170   :  { %v1059_v59 = vld [vmem:[#allocation10 + $0xe8] sm:$0xff]  ;;  %v1060_v8 = vld [vmem:[#allocation10 + $0xf0] sm:$0xff] }
 0x172   :  { %1449 = vmatpush1.bf16.msra.mxu0 %v1448_v10  ;;  %1577 = vmatpush1.bf16.msra.mxu1 %v1576_v11  ;;  %v1083_v10 = vld [vmem:[#allocation10 + $0x1a8] sm:$0xff]  ;;  %v1596_v11 = vpack.c.bf16 %v1033_v1, %v1032_v0  ;;  %v1614_v0 = vpack.c.bf16 %v1059_v59, %v1058_v58  ;;  %v1646_v1 = vpack.c.bf16 %v1091_v61, %v1090_v60 }
 0x173   :  { %1451 = vmatprep.subr.bf16.mxu0 %v1450_v14  ;;  %1579 = vmatprep.subr.bf16.mxu1 %v1578_v15  ;;  %v1035_v14 = vld [vmem:[#allocation10 + $0x28] sm:$0xff]  ;;  %v1630_v15 = vpack.c.bf16 %v1083_v10, %v1082_v9  ;;  %v1061_v9 = vld [vmem:[#allocation10 + $0xf8] sm:$0xff]  ;;  %v1092_v10 = vld [vmem:[#allocation10 + $0x1f0] sm:$0xff] }
 0x176   :  { %1453 = vmatpush1.bf16.msra.mxu0 %v1452_v25  ;;  %1581 = vmatpush1.bf16.msra.mxu1 %v1580_v26  ;;  %v1600_v25 = vpack.c.bf16 %v1035_v14, %v1034_v13  ;;  %v1632_v26 = vpack.c.bf16 %v1067_v17, %v1066_v16  ;;  %v1044_v13 = vld [vmem:[#allocation10 + $0x70] sm:$0xff]  ;;  %v1045_v14 = vld [vmem:[#allocation10 + $0x78] sm:$0xff] }
 0x177   :  { %1455 = vmatprep.subr.bf16.mxu0 %v1454_v29  ;;  %1583 = vmatprep.subr.bf16.mxu1 %v1582_v30  ;;  %v1602_v29 = vpack.c.bf16 %v1053_v21, %v1052_v19  ;;  %v1634_v30 = vpack.c.bf16 %v1085_v24, %v1084_v22  ;;  %v1076_v16 = vld [vmem:[#allocation10 + $0x170] sm:$0xff]  ;;  %v1077_v17 = vld [vmem:[#allocation10 + $0x178] sm:$0xff]  ;;  %v708_v21 = vsub.s32 1, %v1948_v18  ;;  %v712_v22 = vsub.s32 5, %v1948_v18 }
 0x178   :  { %v1652_v19 = vpack.c.bf16 %v1077_v17, %v1076_v16 }
 0x179   :  { %v709_v24 = vrot.slane %v1954_v20, %v708_v21 }
 0x17a   :  { %1457 = vmatpush1.bf16.msra.mxu0 %v1456_v37  ;;  %1585 = vmatpush1.bf16.msra.mxu1 %v1584_v38  ;;  %v1604_v37 = vpack.c.bf16 %v1037_v28, %v1036_v27  ;;  %v1636_v38 = vpack.c.bf16 %v1069_v32, %v1068_v31  ;;  %v721_v27 = vrot.slane %v1961_v23, %v712_v22 }
 0x17b   :  { %1459 = vmatprep.subr.bf16.mxu0 %v1458_v41  ;;  %1587 = vmatprep.subr.bf16.mxu1 %v1586_v42  ;;  %v1606_v41 = vpack.c.bf16 %v1055_v34, %v1054_v33  ;;  %v1638_v42 = vpack.c.bf16 %v1087_v36, %v1086_v35  ;;  %v729_v28 = vrot.slane %v709_v24, %v708_v21 }
 0x17c   :  { %v741_v31 = vrot.slane %v721_v27, %v708_v21 }
 0x17e   :  { %1461 = vmatpush1.bf16.msra.mxu0 %v1460_v50  ;;  %1589 = vmatpush1.bf16.msra.mxu1 %v1588_v51  ;;  %v1608_v50 = vpack.c.bf16 %v1039_v40, %v1038_v39  ;;  %v1640_v51 = vpack.c.bf16 %v1071_v44, %v1070_v43 }
 0x17f   :  { %1591 = vmatprep.subr.bf16.mxu0 %v1590_v54  ;;  %1623 = vmatprep.subr.bf16.mxu1 %v1622_v55  ;;  %v1610_v54 = vpack.c.bf16 %v1057_v46, %v1056_v45  ;;  %v1642_v55 = vpack.c.bf16 %v1089_v48, %v1088_v47 }
 0x181   :  { %878 = vmatmul.mubr.f32.vlgmr.msra.gmra.mrb[2].mxu0 %v448_v2  ;;  %1020 = vmatmul.mubr.f32.vlgmr.msra.gmra.mrb[2].mxu1 %v448_v2  ;;  %v1042_v2 = vld [vmem:[#allocation10 + $0x60] sm:$0xff] }
 0x182   :  { %1593 = vmatpush3.bf16.msra.mxu0 %v1592_v62  ;;  %1625 = vmatpush3.bf16.msra.mxu1 %v1624_v63  ;;  %v1612_v62 = vpack.c.bf16 %v1041_v53, %v1040_v52  ;;  %v1644_v63 = vpack.c.bf16 %v1073_v57, %v1072_v56 }
 0x183   :  { %1595 = vmatprep.subr.bf16.mxu0 %v1594_v3  ;;  %1627 = vmatprep.subr.bf16.mxu1 %v1626_v4  ;;  %v1043_v3 = vld [vmem:[#allocation10 + $0x68] sm:$0xff]  ;;  %v1074_v4 = vld [vmem:[#allocation10 + $0x160] sm:$0xff] }
 0x184   :  { %v1616_v5 = vpack.c.bf16 %v1043_v3, %v1042_v2  ;;  %v1648_v7 = vpack.c.bf16 %v1075_v6, %v1074_v4 }
 0x186   :  { %1597 = vmatpush3.bf16.msra.mxu0 %v1596_v11  ;;  %1629 = vmatpush3.bf16.msra.mxu1 %v1628_v12  ;;  %v1618_v11 = vpack.c.bf16 %v1061_v9, %v1060_v8  ;;  %v1093_v12 = vld [vmem:[#allocation10 + $0x1f8] sm:$0xff] }
 0x187   :  { %1599 = vmatprep.subr.bf16.mxu0 %v1598_v49  ;;  %1631 = vmatprep.subr.bf16.mxu1 %v1630_v15  ;;  %v1650_v49 = vpack.c.bf16 %v1093_v12, %v1092_v10  ;;  %v1620_v15 = vpack.c.bf16 %v1045_v14, %v1044_v13 }
 0x18a   :  { %1601 = vmatpush3.bf16.msra.mxu0 %v1600_v25  ;;  %1633 = vmatpush3.bf16.msra.mxu1 %v1632_v26  ;;  %v717_v25 = vrot.slane %v1961_v23, %v708_v21  ;;  %v713_v26 = vrot.slane %v1954_v20, %v712_v22  ;;  %v1096_v23 = vsub.s32 2, %v1948_v18 }
 0x18b   :  { %1603 = vmatprep.subr.bf16.mxu0 %v1602_v29  ;;  %1635 = vmatprep.subr.bf16.mxu1 %v1634_v30 }
 0x18c   :  { %v737_v29 = vrot.slane %v717_v25, %v708_v21  ;;  %v733_v30 = vrot.slane %v713_v26, %v708_v21  ;;  %v1097_v46 = vrot.slane %v1954_v20, %v1096_v23 }
 0x18e   :  { %1605 = vmatpush3.bf16.msra.mxu0 %v1604_v37  ;;  %1637 = vmatpush3.bf16.msra.mxu1 %v1636_v38 }
 0x18f   :  { %1607 = vmatprep.subr.bf16.mxu0 %v1606_v41  ;;  %1639 = vmatprep.subr.bf16.mxu1 %v1638_v42 }
 0x192   :  { %1609 = vmatpush3.bf16.msra.mxu0 %v1608_v50  ;;  %1641 = vmatpush3.bf16.msra.mxu1 %v1640_v51 }
 0x193   :  { %1611 = vmatprep.subr.bf16.mxu0 %v1610_v54  ;;  %1643 = vmatprep.subr.bf16.mxu1 %v1642_v55 }
 0x196   :  { %1613 = vmatpush3.bf16.msra.mxu0 %v1612_v62  ;;  %1645 = vmatpush3.bf16.msra.mxu1 %v1644_v63 }
 0x197   :  { %1615 = vmatprep.subr.bf16.mxu0 %v1614_v0  ;;  %1647 = vmatprep.subr.bf16.mxu1 %v1646_v1 }
 0x19a   :  { %1617 = vmatpush3.bf16.msra.mxu0 %v1616_v5  ;;  %1649 = vmatpush3.bf16.msra.mxu1 %v1648_v7 }
 0x19b   :  { %1619 = vmatprep.subr.bf16.mxu0 %v1618_v11  ;;  %1651 = vmatprep.subr.bf16.mxu1 %v1650_v49 }
 0x19e   :  { %1621 = vmatpush3.bf16.msra.mxu0 %v1620_v15  ;;  %1653 = vmatpush3.bf16.msra.mxu1 %v1652_v19 }
 0x254   :  { %v879_v32 = vpop.f32.mrb[2].mxu0  ;;  %v1021_v33 = vpop.f32.mrb[2].mxu1 }
 0x255   :  { %v1654_v34 = vadd.f32 %v879_v32, %v729_v28  ;;  %v1656_v35 = vadd.f32 %v1021_v33, %v737_v29  ;;  %v881_v36 = vpop.f32.mrb[3].mxu0  ;;  %v1023_v37 = vpop.f32.mrb[3].mxu1 }
 0x256   :  { %v1655_v38 = vadd.f32 %v881_v36, %v733_v30  ;;  %v1657_v39 = vadd.f32 %v1023_v37, %v741_v31 }
 0x257   :  { %v1026_v42 = vmax.f32 %v1654_v34, 0.0  ;;  %v1028_v43 = vmax.f32 %v1656_v35, 0.0 }
 0x258   :  { %v1027_v40 = vmax.f32 %v1655_v38, 0.0  ;;  %v1029_v41 = vmax.f32 %v1657_v39, 0.0 }
 0x25a   :  { %1162 = vmatprep.mubr.f32.mxu0 %v1027_v40  ;;  %1232 = vmatprep.mubr.f32.mxu1 %v1029_v41 }
 0x25b   :  { %1163 = vmatmul.mubr.f32.vlgmr.msra.gmra.mrb[4].mxu0 %v1026_v42  ;;  %1233 = vmatmul.mubr.f32.vlgmr.msra.gmra.mrb[4].mxu1 %v1028_v43 }
 0x32e   :  { %v1296_v44 = vpop.f32.mrb[4].mxu0  ;;  %v1331_v45 = vpop.f32.mrb[4].mxu1 }
 0x32f   :  { %v1297_v47 = vpop.f32.mrb[5].mxu0  ;;  %v1332_v48 = vpop.f32.mrb[5].mxu1 }
 0x330   :  { %v1298_v50 = vadd.f32 %v1297_v47, %v1296_v44  ;;  %v1333_v51 = vadd.f32 %v1332_v48, %v1331_v45 }
 0x332   :  { %v1165_v52 = vadd.f32 %v1298_v50, %v1097_v46 }
 0x334   :  { %v1235_v53 = vadd.f32 %v1333_v51, %v1165_v52 }
 0x336   :  { %1238 = vst [vmem:[#allocation11] sm:$0x3] %v1235_v53 }
 0x337   :  { %1800 = shalt.err (!%p1797_p2)
}
 0x338   :  { %s1801_s21 = scalar_lea.hbm %s1996_s7, 32 }
 0x339   :  { %p1802_p3 = scmp.ne.s32.totalorder %s1996_s7, %s1801_s21  ;;  %p1805_p4 = scmp.lt.u32.totalorder %s1801_s21, %s1996_s7 }
 0x33b   :  { %p1807_p5 = pnand %p1805_p4, %p1802_p3 }
 0x33d   :  { %1810 = shalt.err (!%p1807_p5)
}
 0x33e   :  { %1248 = dma.vmem_to_hbm [thread:$0]  %s1246_s17, 32, %s1996_s7, [#allocation4]  }
 0x33f   :  { %1817 = dma.done.wait [#allocation4], 32  }
 0x340   :  { %1818 = vsyncadd [#allocation4], 4294967264 }
 0x341   :  { %1252 = vsyncpa [#allocation3], 1 }
 0x342   :  { %1253 = vsyncpa [#allocation6], 1 }
 0x343   :  { %1254 = vsyncpa [#allocation9], 1 }
 0x344   :  { %1255 = vsyncpa [#allocation4], 1 }

</bundles_post_ra>
